<compile_context>
chip_gen: v7x
topology: tpu7x:2x2x1
jax: 0.10.0
libtpu: 0.0.40
codegen_flags: <defaults>
</compile_context>

<pallas_src>
import functools
import numpy as np
import jax
import jax.numpy as jnp
from jax.experimental import pallas as pl
from jax.experimental.pallas import tpu as pltpu

# ---------------- configuration (small, consistent with the module) ----------
DIM = 32           # C
WINDOW = 4         # window_size -> window_area N = 16
NUM_HEADS = 2
HEAD_DIM = DIM // NUM_HEADS
N_TOK = WINDOW * WINDOW
SCALE = HEAD_DIM ** (-0.5)
B_WIN = 4          # number of windows (B_)


# ---------------- Pallas kernel ----------------------------------------------
def window_attn_kernel(x_ref, wq_ref, wk_ref, wv_ref, bq_ref, bk_ref, bv_ref,
                       bias_ref, wp_ref, bp_ref, o_ref, *, num_heads):
    # x_ref:    (M, C)        all windows' tokens, M = B_*N
    # wq/wk/wv: (H, C, hd)    per-head projection slabs (scale folded into Q)
    # bq/bk/bv: (H, 1, hd)    per-head biases (scale folded into Q bias)
    # bias_ref: (H, M, M)     block-diagonal rel-pos bias (-1e9 off-diagonal)
    # wp_ref:   (H, hd, C)    output-proj weight split by concat-head rows
    # bp_ref:   (1, C)        output-proj bias
    # o_ref:    (M, C)        output
    x = x_ref[...]                                                    # (M, C)

    acc = None
    for h in range(num_heads):                       # static unroll over heads
        q = jnp.dot(x, wq_ref[h], preferred_element_type=jnp.float32) + bq_ref[h]
        k = jnp.dot(x, wk_ref[h], preferred_element_type=jnp.float32) + bk_ref[h]
        v = jnp.dot(x, wv_ref[h], preferred_element_type=jnp.float32) + bv_ref[h]

        # scores over the whole flattened token axis; off-window entries are
        # driven to -1e9 by the block-diagonal bias -> exp() == 0 there.
        s = jnp.dot(q, k.T, preferred_element_type=jnp.float32) + bias_ref[h]

        # softmax over last axis (matches nn.Softmax(dim=-1), per window)
        s = s - jnp.max(s, axis=-1, keepdims=True)
        p = jnp.exp(s)
        inv = pl.reciprocal(jnp.sum(p, axis=-1, keepdims=True), approx=True)
        p = p * inv

        oh = jnp.dot(p, v, preferred_element_type=jnp.float32)        # (M, hd)
        # fold the head back in via its slice of the projection weight
        yh = jnp.dot(oh, wp_ref[h], preferred_element_type=jnp.float32)  # (M, C)
        acc = yh if acc is None else acc + yh

    o_ref[...] = (acc + bp_ref[...]).astype(o_ref.dtype)


def window_attention(x, wq_h, wk_h, wv_h, bq_h, bk_h, bv_h, big_bias, wp_h, bproj):
    """x: (B_, N, C) float32.  Returns (B_, N, C)."""
    B_, N, C = x.shape
    H = wq_h.shape[0]
    M = B_ * N
    x_flat = x.reshape(M, C)                      # lane-friendly flat row block

    kernel = functools.partial(window_attn_kernel, num_heads=H)
    vmem = pl.BlockSpec(memory_space=pltpu.MemorySpace.VMEM)
    y = pl.pallas_call(
        kernel,
        out_shape=jax.ShapeDtypeStruct((M, C), x.dtype),
        in_specs=[vmem] * 10,
        out_specs=vmem,
    )(x_flat, wq_h, wk_h, wv_h, bq_h, bk_h, bv_h, big_bias, wp_h, bproj)
    return y.reshape(B_, N, C)


# ---------------- parameter setup (deterministic, in-script) -----------------
def make_relative_position_index(win_h, win_w):
    coords = np.stack(np.meshgrid(np.arange(win_h), np.arange(win_w),
                                  indexing="ij"))                    # (2, h, w)
    coords_flatten = coords.reshape(2, -1)                           # (2, N)
    rel = coords_flatten[:, :, None] - coords_flatten[:, None, :]    # (2, N, N)
    rel = rel.transpose(1, 2, 0).copy()                              # (N, N, 2)
    rel[:, :, 0] += win_h - 1
    rel[:, :, 1] += win_w - 1
    rel[:, :, 0] *= 2 * win_w - 1
    return rel.sum(-1)                                               # (N, N)


def prepare_kernel_params(wqkv_t, bqkv, rel_bias, wproj_t, bproj, num_windows):
    """One-time preprocessing: per-head weight slabs, scale folding, and the
    block-diagonal relative-position bias over the flattened token axis."""
    C = wqkv_t.shape[0]
    H, N, _ = rel_bias.shape
    hd = C // H
    scale = hd ** (-0.5)

    wq_t = wqkv_t[:, 0 * C:1 * C] * scale        # fold attention scale into Q
    wk_t = wqkv_t[:, 1 * C:2 * C]
    wv_t = wqkv_t[:, 2 * C:3 * C]
    bq = bqkv[0, 0 * C:1 * C] * scale
    bk = bqkv[0, 1 * C:2 * C]
    bv = bqkv[0, 2 * C:3 * C]

    # per-head slabs: (H, C, hd) weights, (H, 1, hd) biases (head-major cols)
    wq_h = jnp.transpose(wq_t.reshape(C, H, hd), (1, 0, 2))
    wk_h = jnp.transpose(wk_t.reshape(C, H, hd), (1, 0, 2))
    wv_h = jnp.transpose(wv_t.reshape(C, H, hd), (1, 0, 2))
    bq_h = bq.reshape(H, 1, hd)
    bk_h = bk.reshape(H, 1, hd)
    bv_h = bv.reshape(H, 1, hd)

    # output projection split along its input (concat-head) rows: (H, hd, C)
    wp_h = wproj_t.reshape(H, hd, C)

    # block-diagonal bias over the flattened (num_windows*N) token axis:
    # rel-pos bias on diagonal blocks, -1e9 elsewhere (kills cross-window attn)
    M = num_windows * N
    win_id = jnp.arange(M) // N
    same_win = win_id[:, None] == win_id[None, :]                    # (M, M)
    big_bias = jnp.where(same_win[None, :, :],
                         jnp.tile(rel_bias, (1, num_windows, num_windows)),
                         jnp.float32(-1e9)).astype(jnp.float32)      # (H, M, M)

    return wq_h, wk_h, wv_h, bq_h, bk_h, bv_h, big_bias, wp_h, bproj


def reference_forward(x, wqkv_t, bqkv, rel_bias, wproj_t, bproj):
    """Pure-JAX reference matching the PyTorch forward (mask=None)."""
    B_, N, C = x.shape
    H, hd = NUM_HEADS, HEAD_DIM
    qkv = x @ wqkv_t + bqkv[0]                                       # (B_, N, 3C)
    qkv = qkv.reshape(B_, N, 3, H, hd).transpose(2, 0, 3, 1, 4)      # (3,B_,H,N,hd)
    q, k, v = qkv[0], qkv[1], qkv[2]
    attn = jnp.einsum("bhnd,bhmd->bhnm", q * SCALE, k) + rel_bias[None]
    attn = jax.nn.softmax(attn, axis=-1)
    y = jnp.einsum("bhnm,bhmd->bhnd", attn, v)
    y = y.transpose(0, 2, 1, 3).reshape(B_, N, C)
    return y @ wproj_t + bproj[0]


if __name__ == "__main__":
    key = jax.random.PRNGKey(0)
    k_x, k_tab, k_wq, k_bq, k_wp, k_bp = jax.random.split(key, 6)

    # input: (B_, N, C) = (num_windows, window_area, dim)
    x = jax.random.normal(k_x, (B_WIN, N_TOK, DIM), dtype=jnp.float32)

    # relative position bias table: ((2h-1)*(2w-1), num_heads), trunc_normal std=0.02
    table_rows = (2 * WINDOW - 1) * (2 * WINDOW - 1)
    rpb_table = 0.02 * jax.random.truncated_normal(
        k_tab, -2.0, 2.0, (table_rows, NUM_HEADS), dtype=jnp.float32)

    rpi = jnp.asarray(make_relative_position_index(WINDOW, WINDOW))  # (N, N)
    rel_bias = rpb_table[rpi.reshape(-1)].reshape(N_TOK, N_TOK, NUM_HEADS)
    rel_bias = jnp.transpose(rel_bias, (2, 0, 1))                    # (H, N, N)

    # qkv Linear(dim, 3*dim): weight (3C, C); pass transpose so kernel does x @ W^T
    wqkv = 0.02 * jax.random.normal(k_wq, (3 * DIM, DIM), dtype=jnp.float32)
    bqkv = 0.02 * jax.random.normal(k_bq, (1, 3 * DIM), dtype=jnp.float32)
    wqkv_t = wqkv.T                                                  # (C, 3C)

    # proj Linear(dim, dim): weight (C, C)
    wproj = 0.02 * jax.random.normal(k_wp, (DIM, DIM), dtype=jnp.float32)
    bproj = 0.02 * jax.random.normal(k_bp, (1, DIM), dtype=jnp.float32)
    wproj_t = wproj.T

    params = prepare_kernel_params(wqkv_t, bqkv, rel_bias, wproj_t, bproj, B_WIN)

    out = window_attention(x, *params)
    out = jax.block_until_ready(out)

    ref = reference_forward(x, wqkv_t, bqkv, rel_bias, wproj_t, bproj)
    np.testing.assert_allclose(np.asarray(out), np.asarray(ref),
                               rtol=5e-4, atol=1e-4)
    print("KERNEL_OK")
</pallas_src>

<mosaic_0001>
module attributes {stable_mosaic.version = 11 : i64} {
  func.func @window_attn_kernel(%arg0: memref<64x32xf32, #tpu.memory_space<vmem>>, %arg1: memref<2x32x16xf32, #tpu.memory_space<vmem>>, %arg2: memref<2x32x16xf32, #tpu.memory_space<vmem>>, %arg3: memref<2x32x16xf32, #tpu.memory_space<vmem>>, %arg4: memref<2x1x16xf32, #tpu.memory_space<vmem>>, %arg5: memref<2x1x16xf32, #tpu.memory_space<vmem>>, %arg6: memref<2x1x16xf32, #tpu.memory_space<vmem>>, %arg7: memref<2x64x64xf32, #tpu.memory_space<vmem>>, %arg8: memref<2x16x32xf32, #tpu.memory_space<vmem>>, %arg9: memref<1x32xf32, #tpu.memory_space<vmem>>, %arg10: memref<64x32xf32, #tpu.memory_space<vmem>>) attributes {dimension_semantics = [], scalar_prefetch = 0 : i64, scratch_operands = 0 : i64, tpu.core_type = #tpu.core_type<tc>} {
    %c0 = arith.constant 0 : index
    %c0_0 = arith.constant 0 : index
    %0 = vector.load %arg0[%c0, %c0_0] : memref<64x32xf32, #tpu.memory_space<vmem>>, vector<64x32xf32>
    %c0_1 = arith.constant 0 : index
    %c0_2 = arith.constant 0 : index
    %c0_3 = arith.constant 0 : index
    %1 = vector.load %arg1[%c0_1, %c0_2, %c0_3] : memref<2x32x16xf32, #tpu.memory_space<vmem>>, vector<1x32x16xf32>
    %2 = vector.shape_cast %1 : vector<1x32x16xf32> to vector<32x16xf32>
    %cst = arith.constant dense<0.000000e+00> : vector<64x16xf32>
    %3 = tpu.matmul %0, %2, %cst {dimension_numbers = #tpu.dot_dimension_numbers<[1], [0], [0], [1], [0, 0, 1, 1], [], []>} : vector<64x32xf32>, vector<32x16xf32>, vector<64x16xf32> -> vector<64x16xf32>
    %c0_4 = arith.constant 0 : index
    %c0_5 = arith.constant 0 : index
    %c0_6 = arith.constant 0 : index
    %4 = vector.load %arg4[%c0_4, %c0_5, %c0_6] : memref<2x1x16xf32, #tpu.memory_space<vmem>>, vector<1x1x16xf32>
    %5 = vector.shape_cast %4 : vector<1x1x16xf32> to vector<1x16xf32>
    %6 = vector.broadcast %5 : vector<1x16xf32> to vector<64x16xf32>
    %7 = arith.addf %3, %6 : vector<64x16xf32>
    %c0_7 = arith.constant 0 : index
    %c0_8 = arith.constant 0 : index
    %c0_9 = arith.constant 0 : index
    %8 = vector.load %arg2[%c0_7, %c0_8, %c0_9] : memref<2x32x16xf32, #tpu.memory_space<vmem>>, vector<1x32x16xf32>
    %9 = vector.shape_cast %8 : vector<1x32x16xf32> to vector<32x16xf32>
    %cst_10 = arith.constant dense<0.000000e+00> : vector<64x16xf32>
    %10 = tpu.matmul %0, %9, %cst_10 {dimension_numbers = #tpu.dot_dimension_numbers<[1], [0], [0], [1], [0, 0, 1, 1], [], []>} : vector<64x32xf32>, vector<32x16xf32>, vector<64x16xf32> -> vector<64x16xf32>
    %c0_11 = arith.constant 0 : index
    %c0_12 = arith.constant 0 : index
    %c0_13 = arith.constant 0 : index
    %11 = vector.load %arg5[%c0_11, %c0_12, %c0_13] : memref<2x1x16xf32, #tpu.memory_space<vmem>>, vector<1x1x16xf32>
    %12 = vector.shape_cast %11 : vector<1x1x16xf32> to vector<1x16xf32>
    %13 = vector.broadcast %12 : vector<1x16xf32> to vector<64x16xf32>
    %14 = arith.addf %10, %13 : vector<64x16xf32>
    %c0_14 = arith.constant 0 : index
    %c0_15 = arith.constant 0 : index
    %c0_16 = arith.constant 0 : index
    %15 = vector.load %arg3[%c0_14, %c0_15, %c0_16] : memref<2x32x16xf32, #tpu.memory_space<vmem>>, vector<1x32x16xf32>
    %16 = vector.shape_cast %15 : vector<1x32x16xf32> to vector<32x16xf32>
    %cst_17 = arith.constant dense<0.000000e+00> : vector<64x16xf32>
    %17 = tpu.matmul %0, %16, %cst_17 {dimension_numbers = #tpu.dot_dimension_numbers<[1], [0], [0], [1], [0, 0, 1, 1], [], []>} : vector<64x32xf32>, vector<32x16xf32>, vector<64x16xf32> -> vector<64x16xf32>
    %c0_18 = arith.constant 0 : index
    %c0_19 = arith.constant 0 : index
    %c0_20 = arith.constant 0 : index
    %18 = vector.load %arg6[%c0_18, %c0_19, %c0_20] : memref<2x1x16xf32, #tpu.memory_space<vmem>>, vector<1x1x16xf32>
    %19 = vector.shape_cast %18 : vector<1x1x16xf32> to vector<1x16xf32>
    %20 = vector.broadcast %19 : vector<1x16xf32> to vector<64x16xf32>
    %21 = arith.addf %17, %20 : vector<64x16xf32>
    %22 = tpu.transpose %14, [1, 0] : vector<64x16xf32> -> vector<16x64xf32>
    %cst_21 = arith.constant dense<0.000000e+00> : vector<64x64xf32>
    %23 = tpu.matmul %7, %22, %cst_21 {dimension_numbers = #tpu.dot_dimension_numbers<[1], [0], [0], [1], [0, 0, 1, 1], [], []>} : vector<64x16xf32>, vector<16x64xf32>, vector<64x64xf32> -> vector<64x64xf32>
    %c0_22 = arith.constant 0 : index
    %c0_23 = arith.constant 0 : index
    %c0_24 = arith.constant 0 : index
    %24 = vector.load %arg7[%c0_22, %c0_23, %c0_24] : memref<2x64x64xf32, #tpu.memory_space<vmem>>, vector<1x64x64xf32>
    %25 = vector.shape_cast %24 : vector<1x64x64xf32> to vector<64x64xf32>
    %26 = arith.addf %23, %25 : vector<64x64xf32>
    %cst_25 = arith.constant dense<0xFF800000> : vector<64xf32>
    %27 = vector.multi_reduction <maximumf>, %26, %cst_25 [1] : vector<64x64xf32> to vector<64xf32>
    %28 = vector.shape_cast %27 : vector<64xf32> to vector<64x1xf32>
    %29 = vector.broadcast %28 : vector<64x1xf32> to vector<64x64xf32>
    %30 = arith.subf %26, %29 : vector<64x64xf32>
    %31 = math.exp %30 : vector<64x64xf32>
    %cst_26 = arith.constant dense<0.000000e+00> : vector<64xf32>
    %32 = vector.multi_reduction <add>, %31, %cst_26 [1] : vector<64x64xf32> to vector<64xf32>
    %33 = vector.shape_cast %32 : vector<64xf32> to vector<64x1xf32>
    %34 = tpu.reciprocal %33 {approx = true} : vector<64x1xf32> -> vector<64x1xf32>
    %35 = vector.broadcast %34 : vector<64x1xf32> to vector<64x64xf32>
    %36 = arith.mulf %31, %35 : vector<64x64xf32>
    %cst_27 = arith.constant dense<0.000000e+00> : vector<64x16xf32>
    %37 = tpu.matmul %36, %21, %cst_27 {dimension_numbers = #tpu.dot_dimension_numbers<[1], [0], [0], [1], [0, 0, 1, 1], [], []>} : vector<64x64xf32>, vector<64x16xf32>, vector<64x16xf32> -> vector<64x16xf32>
    %c0_28 = arith.constant 0 : index
    %c0_29 = arith.constant 0 : index
    %c0_30 = arith.constant 0 : index
    %38 = vector.load %arg8[%c0_28, %c0_29, %c0_30] : memref<2x16x32xf32, #tpu.memory_space<vmem>>, vector<1x16x32xf32>
    %39 = vector.shape_cast %38 : vector<1x16x32xf32> to vector<16x32xf32>
    %cst_31 = arith.constant dense<0.000000e+00> : vector<64x32xf32>
    %40 = tpu.matmul %37, %39, %cst_31 {dimension_numbers = #tpu.dot_dimension_numbers<[1], [0], [0], [1], [0, 0, 1, 1], [], []>} : vector<64x16xf32>, vector<16x32xf32>, vector<64x32xf32> -> vector<64x32xf32>
    %c1 = arith.constant 1 : index
    %c0_32 = arith.constant 0 : index
    %c0_33 = arith.constant 0 : index
    %41 = vector.load %arg1[%c1, %c0_32, %c0_33] : memref<2x32x16xf32, #tpu.memory_space<vmem>>, vector<1x32x16xf32>
    %42 = vector.shape_cast %41 : vector<1x32x16xf32> to vector<32x16xf32>
    %cst_34 = arith.constant dense<0.000000e+00> : vector<64x16xf32>
    %43 = tpu.matmul %0, %42, %cst_34 {dimension_numbers = #tpu.dot_dimension_numbers<[1], [0], [0], [1], [0, 0, 1, 1], [], []>} : vector<64x32xf32>, vector<32x16xf32>, vector<64x16xf32> -> vector<64x16xf32>
    %c1_35 = arith.constant 1 : index
    %c0_36 = arith.constant 0 : index
    %c0_37 = arith.constant 0 : index
    %44 = vector.load %arg4[%c1_35, %c0_36, %c0_37] : memref<2x1x16xf32, #tpu.memory_space<vmem>>, vector<1x1x16xf32>
    %45 = vector.shape_cast %44 : vector<1x1x16xf32> to vector<1x16xf32>
    %46 = vector.broadcast %45 : vector<1x16xf32> to vector<64x16xf32>
    %47 = arith.addf %43, %46 : vector<64x16xf32>
    %c1_38 = arith.constant 1 : index
    %c0_39 = arith.constant 0 : index
    %c0_40 = arith.constant 0 : index
    %48 = vector.load %arg2[%c1_38, %c0_39, %c0_40] : memref<2x32x16xf32, #tpu.memory_space<vmem>>, vector<1x32x16xf32>
    %49 = vector.shape_cast %48 : vector<1x32x16xf32> to vector<32x16xf32>
    %cst_41 = arith.constant dense<0.000000e+00> : vector<64x16xf32>
    %50 = tpu.matmul %0, %49, %cst_41 {dimension_numbers = #tpu.dot_dimension_numbers<[1], [0], [0], [1], [0, 0, 1, 1], [], []>} : vector<64x32xf32>, vector<32x16xf32>, vector<64x16xf32> -> vector<64x16xf32>
    %c1_42 = arith.constant 1 : index
    %c0_43 = arith.constant 0 : index
    %c0_44 = arith.constant 0 : index
    %51 = vector.load %arg5[%c1_42, %c0_43, %c0_44] : memref<2x1x16xf32, #tpu.memory_space<vmem>>, vector<1x1x16xf32>
    %52 = vector.shape_cast %51 : vector<1x1x16xf32> to vector<1x16xf32>
    %53 = vector.broadcast %52 : vector<1x16xf32> to vector<64x16xf32>
    %54 = arith.addf %50, %53 : vector<64x16xf32>
    %c1_45 = arith.constant 1 : index
    %c0_46 = arith.constant 0 : index
    %c0_47 = arith.constant 0 : index
    %55 = vector.load %arg3[%c1_45, %c0_46, %c0_47] : memref<2x32x16xf32, #tpu.memory_space<vmem>>, vector<1x32x16xf32>
    %56 = vector.shape_cast %55 : vector<1x32x16xf32> to vector<32x16xf32>
    %cst_48 = arith.constant dense<0.000000e+00> : vector<64x16xf32>
    %57 = tpu.matmul %0, %56, %cst_48 {dimension_numbers = #tpu.dot_dimension_numbers<[1], [0], [0], [1], [0, 0, 1, 1], [], []>} : vector<64x32xf32>, vector<32x16xf32>, vector<64x16xf32> -> vector<64x16xf32>
    %c1_49 = arith.constant 1 : index
    %c0_50 = arith.constant 0 : index
    %c0_51 = arith.constant 0 : index
    %58 = vector.load %arg6[%c1_49, %c0_50, %c0_51] : memref<2x1x16xf32, #tpu.memory_space<vmem>>, vector<1x1x16xf32>
    %59 = vector.shape_cast %58 : vector<1x1x16xf32> to vector<1x16xf32>
    %60 = vector.broadcast %59 : vector<1x16xf32> to vector<64x16xf32>
    %61 = arith.addf %57, %60 : vector<64x16xf32>
    %62 = tpu.transpose %54, [1, 0] : vector<64x16xf32> -> vector<16x64xf32>
    %cst_52 = arith.constant dense<0.000000e+00> : vector<64x64xf32>
    %63 = tpu.matmul %47, %62, %cst_52 {dimension_numbers = #tpu.dot_dimension_numbers<[1], [0], [0], [1], [0, 0, 1, 1], [], []>} : vector<64x16xf32>, vector<16x64xf32>, vector<64x64xf32> -> vector<64x64xf32>
    %c1_53 = arith.constant 1 : index
    %c0_54 = arith.constant 0 : index
    %c0_55 = arith.constant 0 : index
    %64 = vector.load %arg7[%c1_53, %c0_54, %c0_55] : memref<2x64x64xf32, #tpu.memory_space<vmem>>, vector<1x64x64xf32>
    %65 = vector.shape_cast %64 : vector<1x64x64xf32> to vector<64x64xf32>
    %66 = arith.addf %63, %65 : vector<64x64xf32>
    %cst_56 = arith.constant dense<0xFF800000> : vector<64xf32>
    %67 = vector.multi_reduction <maximumf>, %66, %cst_56 [1] : vector<64x64xf32> to vector<64xf32>
    %68 = vector.shape_cast %67 : vector<64xf32> to vector<64x1xf32>
    %69 = vector.broadcast %68 : vector<64x1xf32> to vector<64x64xf32>
    %70 = arith.subf %66, %69 : vector<64x64xf32>
    %71 = math.exp %70 : vector<64x64xf32>
    %cst_57 = arith.constant dense<0.000000e+00> : vector<64xf32>
    %72 = vector.multi_reduction <add>, %71, %cst_57 [1] : vector<64x64xf32> to vector<64xf32>
    %73 = vector.shape_cast %72 : vector<64xf32> to vector<64x1xf32>
    %74 = tpu.reciprocal %73 {approx = true} : vector<64x1xf32> -> vector<64x1xf32>
    %75 = vector.broadcast %74 : vector<64x1xf32> to vector<64x64xf32>
    %76 = arith.mulf %71, %75 : vector<64x64xf32>
    %cst_58 = arith.constant dense<0.000000e+00> : vector<64x16xf32>
    %77 = tpu.matmul %76, %61, %cst_58 {dimension_numbers = #tpu.dot_dimension_numbers<[1], [0], [0], [1], [0, 0, 1, 1], [], []>} : vector<64x64xf32>, vector<64x16xf32>, vector<64x16xf32> -> vector<64x16xf32>
    %c1_59 = arith.constant 1 : index
    %c0_60 = arith.constant 0 : index
    %c0_61 = arith.constant 0 : index
    %78 = vector.load %arg8[%c1_59, %c0_60, %c0_61] : memref<2x16x32xf32, #tpu.memory_space<vmem>>, vector<1x16x32xf32>
    %79 = vector.shape_cast %78 : vector<1x16x32xf32> to vector<16x32xf32>
    %cst_62 = arith.constant dense<0.000000e+00> : vector<64x32xf32>
    %80 = tpu.matmul %77, %79, %cst_62 {dimension_numbers = #tpu.dot_dimension_numbers<[1], [0], [0], [1], [0, 0, 1, 1], [], []>} : vector<64x16xf32>, vector<16x32xf32>, vector<64x32xf32> -> vector<64x32xf32>
    %81 = arith.addf %40, %80 : vector<64x32xf32>
    %c0_63 = arith.constant 0 : index
    %c0_64 = arith.constant 0 : index
    %82 = vector.load %arg9[%c0_63, %c0_64] : memref<1x32xf32, #tpu.memory_space<vmem>>, vector<1x32xf32>
    %83 = vector.broadcast %82 : vector<1x32xf32> to vector<64x32xf32>
    %84 = arith.addf %81, %83 : vector<64x32xf32>
    %c0_65 = arith.constant 0 : index
    %c0_66 = arith.constant 0 : index
    %85 = vector.load %arg10[%c0_65, %c0_66] : memref<64x32xf32, #tpu.memory_space<vmem>>, vector<64x32xf32>
    tpu.vector_store %arg10[%c0_65, %c0_66], %84 {strides = array<i32>} : memref<64x32xf32, #tpu.memory_space<vmem>>, vector<64x32xf32>,
    return
  }
}

</mosaic_0001>

<bundles_post_ra>
// kernel: tpu_custom_call.1
= control target key start
LH: loop header
LB: loop body
LE: loop exit
PB: predicated region body
PF: predicated region fallthrough
CT: control target
= control target key end

     0   :  { %vm54_vm0 = vcmask 261120   ;;  %vm424_vm1 = vcmask 130048   ;;  %vm578_vm3 = vcmask 523264   ;;  %s3207_s1 = inlined_call_operand.vmem [shape: f32[2,32,16], index: 1, kind: input, shape index: {}]   ;;  %s3208_s0 = inlined_call_operand.vmem [shape: f32[64,32], index: 0, kind: input, shape index: {}]   ;;  %s3209_s2 = inlined_call_operand.vmem [shape: f32[2,32,16], index: 2, kind: input, shape index: {}]   ;;  %s3210_s4 = inlined_call_operand.vmem [shape: f32[2,1,16], index: 4, kind: input, shape index: {}]   ;;  %s3211_s5 = inlined_call_operand.vmem [shape: f32[2,1,16], index: 5, kind: input, shape index: {}]   ;;  %s3212_s3 = inlined_call_operand.vmem [shape: f32[2,32,16], index: 3, kind: input, shape index: {}]   ;;  %s3213_s7 = inlined_call_operand.vmem [shape: f32[2,64,64], index: 7, kind: input, shape index: {}]   ;;  %s3214_s6 = inlined_call_operand.vmem [shape: f32[2,1,16], index: 6, kind: input, shape index: {}]   ;;  %s3215_s8 = inlined_call_operand.vmem [shape: f32[2,16,32], index: 8, kind: input, shape index: {}]   ;;  %s3216_s9 = inlined_call_operand.vmem [shape: f32[1,32], index: 9, kind: input, shape index: {}]   ;;  %s3217_s10 = inlined_call_operand.vmem [shape: f32[64,32], index: 10, kind: output, shape index: {}]  }
   0x1   :  { %v43_v0 = vld [vmem:[%s3207_s1] sm:$0xff]  ;;  %v44_v1 = vld [vmem:[%s3207_s1 + $0x8] sm:$0xff]  ;;  %v45_v2 = vld [vmem:[%s3207_s1 + $0x10] sm:$0xff] }
   0x2   :  { %v2383_v3 = vpack.c.bf16 %v44_v1, %v43_v0  ;;  %v46_v4 = vld [vmem:[%s3207_s1 + $0x18] sm:$0xff]  ;;  %v2661_v5 = vld [vmem:[%s3208_s0] sm:$0xff]  ;;  %v185_v8 = vld [vmem:[%s3209_s2 + $0x8] sm:$0xff] }
   0x3   :  { %v2387_v6 = vpack.c.bf16 %v46_v4, %v45_v2  ;;  %2127 = vmatprep.mubr.msk.f32.mxu1 %vm54_vm0, %v2661_v5  ;;  %v184_v7 = vld [vmem:[%s3209_s2] sm:$0xff]  ;;  %2167 = vmatprep.mubr.msk.f32.mxu0 %vm54_vm0, %v2661_v5  ;;  %v186_v10 = vld [vmem:[%s3209_s2 + $0x10] sm:$0xff]  ;;  %v187_v11 = vld [vmem:[%s3209_s2 + $0x18] sm:$0xff] }
   0x4   :  { %2384 = vmatprep.subr.bf16.mxu1 %v2383_v3  ;;  %v2391_v9 = vpack.c.bf16 %v185_v8, %v184_v7  ;;  %v2682_v12 = vld [vmem:[%s3208_s0 + $0x8] sm:$0xff]  ;;  %v2687_v13 = vld [vmem:[%s3208_s0 + $0x10] sm:$0xff]  ;;  %v2395_v14 = vpack.c.bf16 %v187_v11, %v186_v10  ;;  %v2696_v15 = vld [vmem:[%s3208_s0 + $0x18] sm:$0xff] }
   0x5   :  { %2386 = vmatpush3.bf16.msra.mxu1 %v2383_v3  ;;  %v2701_v16 = vld [vmem:[%s3208_s0 + $0x20] sm:$0xff]  ;;  %v2710_v17 = vld [vmem:[%s3208_s0 + $0x28] sm:$0xff]  ;;  %v2715_v18 = vld [vmem:[%s3208_s0 + $0x30] sm:$0xff] }
   0x6   :  { %2388 = vmatprep.subr.bf16.mxu1 %v2387_v6  ;;  %v2724_v19 = vld [vmem:[%s3208_s0 + $0x38] sm:$0xff]  ;;  %v1819_v20 = vld [vmem:[%s3210_s4] ss:$0 sm:$0xff]  ;;  %vm2753_vm2 = vmpackc.low %vm424_vm1, %vm424_vm1 }
   0x7   :  { %v1828_v30 = vld [vmem:[%s3211_s5] ss:$0 sm:$0xff]  ;;  %v301_v60 = vld [vmem:[%s3212_s3 + $0x8] sm:$0xff]  ;;  %v302_v61 = vld [vmem:[%s3212_s3 + $0x10] sm:$0xff] }
   0x8   :  { %v300_v59 = vld [vmem:[%s3212_s3] sm:$0xff]  ;;  %v303_v63 = vld [vmem:[%s3212_s3 + $0x18] sm:$0xff]  ;;  %v417_v3 = vld [vmem:[%s3213_s7 + $0x8] sm:$0xff] }
   0x9   :  { %2390 = vmatpush3.bf16.msra.mxu1 %v2387_v6  ;;  %v2399_v62 = vpack.c.bf16 %v301_v60, %v300_v59  ;;  %v2403_v0 = vpack.c.bf16 %v303_v63, %v302_v61  ;;  %v416_v1 = vld [vmem:[%s3213_s7] sm:$0xff]  ;;  %v418_v7 = vld [vmem:[%s3213_s7 + $0x10] sm:$0xff]  ;;  %v419_v11 = vld [vmem:[%s3213_s7 + $0x18] sm:$0xff] }
   0xa   :  { %2392 = vmatprep.subr.bf16.mxu1 %v2391_v9  ;;  %v1875_v35 = vld [vmem:[%s3210_s4 + $0x1] ss:$0 sm:$0xff] }
   0xb   :  { %2400 = vmatprep.subr.bf16.mxu0 %v2399_v62 }
   0xc   :  { %2128 = vmatmul.mubr.msk.f32.vlgmr.msra.gmra.mrb[0].mxu1 %vm54_vm0, %v2682_v12  ;;  %2402 = vmatpush3.bf16.msra.mxu0 %v2399_v62 }
   0xd   :  { %2394 = vmatpush3.bf16.msra.mxu1 %v2391_v9  ;;  %2130 = vmatprep.mubr.msk.f32.mxu1 %vm54_vm0, %v2687_v13 }
   0xe   :  { %2396 = vmatprep.subr.bf16.mxu1 %v2395_v14  ;;  %2404 = vmatprep.subr.bf16.mxu0 %v2403_v0 }
  0x10   :  { %2131 = vmatmul.mubr.msk.f32.gmra.mrb[2].mxu1 %vm54_vm0, %v2696_v15  ;;  %2406 = vmatpush3.bf16.msra.mxu0 %v2403_v0 }
  0x11   :  { %2133 = vmatprep.mubr.msk.f32.mxu1 %vm54_vm0, %v2701_v16  ;;  %2398 = vmatpush3.bf16.msra.mxu1 %v2395_v14 }
  0x13   :  { %2168 = vmatmul.mubr.msk.f32.vlgmr.msra.gmra.mrb[0].mxu0 %vm54_vm0, %v2682_v12 }
  0x14   :  { %2134 = vmatmul.mubr.msk.f32.gmra.mrb[4].mxu1 %vm54_vm0, %v2710_v17  ;;  %2170 = vmatprep.mubr.msk.f32.mxu0 %vm54_vm0, %v2687_v13 }
  0x15   :  { %2136 = vmatprep.mubr.msk.f32.mxu1 %vm54_vm0, %v2715_v18 }
  0x17   :  { %2171 = vmatmul.mubr.msk.f32.gmra.mrb[2].mxu0 %vm54_vm0, %v2696_v15 }
  0x18   :  { %2137 = vmatmul.mubr.msk.f32.gmra.mrb[6].mxu1 %vm54_vm0, %v2724_v19  ;;  %2173 = vmatprep.mubr.msk.f32.mxu0 %vm54_vm0, %v2701_v16 }
  0x19   :  { %2147 = vmatprep.mubr.msk.f32.mxu1 %vm54_vm0, %v2661_v5 }
  0x1b   :  { %2174 = vmatmul.mubr.msk.f32.gmra.mrb[4].mxu0 %vm54_vm0, %v2710_v17 }
  0x1c   :  { %2148 = vmatmul.mubr.msk.f32.vlgmr.msra.gmra.mrb[8].mxu1 %vm54_vm0, %v2682_v12  ;;  %2176 = vmatprep.mubr.msk.f32.mxu0 %vm54_vm0, %v2715_v18 }
  0x1d   :  { %2150 = vmatprep.mubr.msk.f32.mxu1 %vm54_vm0, %v2687_v13 }
  0x1f   :  { %2177 = vmatmul.mubr.msk.f32.gmra.mrb[6].mxu0 %vm54_vm0, %v2724_v19 }
  0x20   :  { %2151 = vmatmul.mubr.msk.f32.gmra.mrb[10].mxu1 %vm54_vm0, %v2696_v15 }
  0x21   :  { %2153 = vmatprep.mubr.msk.f32.mxu1 %vm54_vm0, %v2701_v16 }
  0x24   :  { %2154 = vmatmul.mubr.msk.f32.gmra.mrb[12].mxu1 %vm54_vm0, %v2710_v17 }
  0x25   :  { %2156 = vmatprep.mubr.msk.f32.mxu1 %vm54_vm0, %v2715_v18 }
  0x28   :  { %2157 = vmatmul.mubr.msk.f32.gmra.mrb[14].mxu1 %vm54_vm0, %v2724_v19 }
  0xdf   :  { %v2129_v21 = vpop.f32.mrb[0].mxu1 }
  0xe0   :  { %v145_v22 = vpop.f32.mrb[1].mxu1  ;;  %v151_v52 = vadd.f32 %v2129_v21, %v1819_v20  ;;  %v420_v21 = vld [vmem:[%s3213_s7 + $0x20] sm:$0xff] }
  0xe1   :  { %v146_v23 = vadd.f32 %v1819_v20, %v145_v22 }
  0xe3   :  { %v2132_v24 = vpop.f32.mrb[2].mxu1  ;;  %2195 = vmatprep.mubr.msk.f32.mxu1 %vm424_vm1, %v146_v23 }
  0xe4   :  { %v155_v25 = vpop.f32.mrb[3].mxu1  ;;  %v161_v54 = vadd.f32 %v2132_v24, %v1819_v20 }
  0xe5   :  { %v156_v53 = vadd.f32 %v1819_v20, %v155_v25 }
  0xe7   :  { %v2135_v26 = vpop.f32.mrb[4].mxu1 }
  0xe8   :  { %v165_v27 = vpop.f32.mrb[5].mxu1  ;;  %v171_v56 = vadd.f32 %v2135_v26, %v1819_v20  ;;  %v421_v26 = vld [vmem:[%s3213_s7 + $0x28] sm:$0xff] }
  0xe9   :  { %v166_v55 = vadd.f32 %v1819_v20, %v165_v27 }
  0xeb   :  { %v2138_v28 = vpop.f32.mrb[6].mxu1 }
  0xec   :  { %v175_v29 = vpop.f32.mrb[7].mxu1  ;;  %v181_v58 = vadd.f32 %v2138_v28, %v1819_v20 }
  0xed   :  { %v176_v57 = vadd.f32 %v1819_v20, %v175_v29  ;;  %v422_v29 = vld [vmem:[%s3213_s7 + $0x30] sm:$0xff] }
  0xef   :  { %v2149_v31 = vpop.f32.mrb[8].mxu1 }
  0xf0   :  { %v267_v32 = vadd.f32 %v2149_v31, %v1828_v30  ;;  %v261_v33 = vpop.f32.mrb[9].mxu1 }
  0xf1   :  { %v262_v34 = vadd.f32 %v1828_v30, %v261_v33 }
  0xf3   :  { %v2407_v36 = vpack.c.bf16 %v267_v32, %v262_v34  ;;  %v2152_v37 = vpop.f32.mrb[10].mxu1  ;;  %v423_v34 = vld [vmem:[%s3213_s7 + $0x38] sm:$0xff] }
  0xf4   :  { %v277_v38 = vadd.f32 %v2152_v37, %v1828_v30  ;;  %v271_v39 = vpop.f32.mrb[11].mxu1 }
  0xf5   :  { %2409 = vmatprep.subr.msk.bf16.mxu1 %vm2753_vm2, %v2407_v36  ;;  %v272_v40 = vadd.f32 %v1828_v30, %v271_v39 }
  0xf6   :  { %2412 = vmatpush3.bf16.xpose.msk.msra.mxu1 %vm2753_vm2, %v2407_v36 }
  0xf7   :  { %v2413_v41 = vpack.c.bf16 %v277_v38, %v272_v40  ;;  %v2155_v42 = vpop.f32.mrb[12].mxu1 }
  0xf8   :  { %v287_v43 = vadd.f32 %v2155_v42, %v1828_v30  ;;  %v281_v44 = vpop.f32.mrb[13].mxu1  ;;  %v1884_v42 = vld [vmem:[%s3209_s2 + $0x20] sm:$0xff] }
  0xf9   :  { %2415 = vmatprep.subr.msk.bf16.mxu1 %vm2753_vm2, %v2413_v41  ;;  %v282_v45 = vadd.f32 %v1828_v30, %v281_v44  ;;  %v1886_v44 = vld [vmem:[%s3209_s2 + $0x30] sm:$0xff] }
  0xfb   :  { %v2419_v46 = vpack.c.bf16 %v287_v43, %v282_v45  ;;  %v2158_v47 = vpop.f32.mrb[14].mxu1  ;;  %v1885_v43 = vld [vmem:[%s3209_s2 + $0x28] sm:$0xff] }
  0xfc   :  { %v297_v48 = vadd.f32 %v2158_v47, %v1828_v30  ;;  %v291_v49 = vpop.f32.mrb[15].mxu1  ;;  %v2455_v45 = vpack.c.bf16 %v1885_v43, %v1884_v42 }
  0xfd   :  { %v292_v50 = vadd.f32 %v1828_v30, %v291_v49  ;;  %v2169_v49 = vpop.f32.mrb[0].mxu0 }
  0xfe   :  { %2418 = vmatpush3.bf16.xpose.msk.msra.mxu1 %vm2753_vm2, %v2413_v41 }
  0xff   :  { %2421 = vmatprep.subr.msk.bf16.mxu1 %vm2753_vm2, %v2419_v46  ;;  %v2425_v51 = vpack.c.bf16 %v297_v48, %v292_v50  ;;  %v2893_v48 = vld [vmem:[%s3214_s6] ss:$0 sm:$0xff] }
 0x100   :  { %v383_v50 = vadd.f32 %v2169_v49, %v2893_v48 }
 0x106   :  { %2424 = vmatpush3.bf16.xpose.msk.msra.mxu1 %vm2753_vm2, %v2419_v46  ;;  %v1887_v46 = vld [vmem:[%s3209_s2 + $0x38] sm:$0xff] }
 0x107   :  { %2427 = vmatprep.subr.msk.bf16.mxu1 %vm2753_vm2, %v2425_v51  ;;  %v2459_v47 = vpack.c.bf16 %v1887_v46, %v1886_v44 }
 0x10e   :  { %2430 = vmatpush3.bf16.xpose.msk.msra.mxu1 %vm2753_vm2, %v2425_v51  ;;  %v377_v51 = vpop.f32.mrb[1].mxu0 }
 0x10f   :  { %2456 = vmatprep.subr.bf16.mxu1 %v2455_v45 }
 0x115   :  { %2196 = vmatmul.mubr.msk.f32.vlgmr.msra.gmra.mrb[16].mxu1 %vm424_vm1, %v151_v52  ;;  %v378_v52 = vadd.f32 %v2893_v48, %v377_v51 }
 0x116   :  { %2198 = vmatprep.mubr.msk.f32.mxu1 %vm424_vm1, %v156_v53  ;;  %2458 = vmatpush3.bf16.msra.mxu1 %v2455_v45 }
 0x117   :  { %2460 = vmatprep.subr.bf16.mxu1 %v2459_v47  ;;  %v2431_v53 = vpack.c.bf16 %v383_v50, %v378_v52 }
 0x119   :  { %2199 = vmatmul.mubr.msk.f32.gmra.mrb[18].mxu1 %vm424_vm1, %v161_v54  ;;  %v2172_v54 = vpop.f32.mrb[2].mxu0  ;;  %2432 = vmatprep.subr.bf16.mxu0 %v2431_v53 }
 0x11a   :  { %2201 = vmatprep.mubr.msk.f32.mxu1 %vm424_vm1, %v166_v55  ;;  %2462 = vmatpush3.bf16.msra.mxu1 %v2459_v47  ;;  %v393_v55 = vadd.f32 %v2172_v54, %v2893_v48 }
 0x11b   :  { %2434 = vmatpush3.bf16.msra.mxu0 %v2431_v53 }
 0x11d   :  { %2202 = vmatmul.mubr.msk.f32.gmra.mrb[20].mxu1 %vm424_vm1, %v171_v56  ;;  %v387_v56 = vpop.f32.mrb[3].mxu0 }
 0x11e   :  { %2204 = vmatprep.mubr.msk.f32.mxu1 %vm424_vm1, %v176_v57  ;;  %v388_v57 = vadd.f32 %v2893_v48, %v387_v56  ;;  %v2175_v43 = vpop.f32.mrb[4].mxu0  ;;  %v1871_v56 = vld [vmem:[%s3207_s1 + $0x28] sm:$0xff] }
 0x11f   :  { %v403_v45 = vadd.f32 %v2175_v43, %v2893_v48  ;;  %v397_v46 = vpop.f32.mrb[5].mxu0 }
 0x120   :  { %v398_v47 = vadd.f32 %v2893_v48, %v397_v46  ;;  %v2178_v50 = vpop.f32.mrb[6].mxu0 }
 0x121   :  { %2205 = vmatmul.mubr.msk.f32.gmra.mrb[22].mxu1 %vm424_vm1, %v181_v58  ;;  %v2435_v58 = vpack.c.bf16 %v393_v55, %v388_v57  ;;  %v407_v51 = vpop.f32.mrb[7].mxu0  ;;  %v413_v52 = vadd.f32 %v2178_v50, %v2893_v48  ;;  %v1870_v55 = vld [vmem:[%s3207_s1 + $0x20] sm:$0xff] }
 0x122   :  { %2263 = vmatprep.mubr.msk.f32.mxu1 %vm54_vm0, %v2661_v5  ;;  %v2439_v49 = vpack.c.bf16 %v403_v45, %v398_v47  ;;  %v408_v53 = vadd.f32 %v2893_v48, %v407_v51  ;;  %v2447_v57 = vpack.c.bf16 %v1871_v56, %v1870_v55 }
 0x123   :  { %2436 = vmatprep.subr.bf16.mxu0 %v2435_v58 }
 0x124   :  { %2438 = vmatpush3.bf16.msra.mxu0 %v2435_v58  ;;  %v2443_v54 = vpack.c.bf16 %v413_v52, %v408_v53  ;;  %v2952_v58 = vld [vmem:[%s3211_s5 + $0x1] ss:$0 sm:$0xff] }
 0x125   :  { %2264 = vmatmul.mubr.msk.f32.vlgmr.msra.gmra.mrb[24].mxu1 %vm54_vm0, %v2682_v12  ;;  %2440 = vmatprep.subr.bf16.mxu0 %v2439_v49 }
 0x126   :  { %2266 = vmatprep.mubr.msk.f32.mxu1 %vm54_vm0, %v2687_v13 }
 0x128   :  { %2442 = vmatpush3.bf16.msra.mxu0 %v2439_v49 }
 0x129   :  { %2267 = vmatmul.mubr.msk.f32.gmra.mrb[26].mxu1 %vm54_vm0, %v2696_v15  ;;  %2444 = vmatprep.subr.bf16.mxu0 %v2443_v54 }
 0x12a   :  { %2269 = vmatprep.mubr.msk.f32.mxu1 %vm54_vm0, %v2701_v16 }
 0x12c   :  { %2446 = vmatpush3.bf16.msra.mxu0 %v2443_v54 }
 0x12d   :  { %2270 = vmatmul.mubr.msk.f32.gmra.mrb[28].mxu1 %vm54_vm0, %v2710_v17  ;;  %2448 = vmatprep.subr.bf16.mxu0 %v2447_v57 }
 0x12e   :  { %2272 = vmatprep.mubr.msk.f32.mxu1 %vm54_vm0, %v2715_v18 }
 0x131   :  { %2273 = vmatmul.mubr.msk.f32.gmra.mrb[30].mxu1 %vm54_vm0, %v2724_v19 }
 0x1e8   :  { %v2197_v2 = vpop.f32.mrb[16].mxu1 }
 0x1e9   :  { %v539_v4 = vpop.f32.mrb[17].mxu1  ;;  %v2819_v8 = vadd.f32 %v2197_v2, %v417_v3 }
 0x1ea   :  { %v2814_v6 = vadd.f32 %v539_v4, %v416_v1 }
 0x1eb   :  { %v582_v25 = vsel %vm578_vm3, %v2819_v8, -inf }
 0x1ec   :  { %v2200_v9 = vpop.f32.mrb[18].mxu1  ;;  %v579_v10 = vsel %vm578_vm3, %v2814_v6, -inf }
 0x1ed   :  { %v549_v14 = vpop.f32.mrb[19].mxu1  ;;  %580 = vmax.xlane.f32.xlu0 %v579_v10  ;;  %v2831_v22 = vadd.f32 %v2200_v9, %v419_v11 }
 0x1ee   :  { %v2826_v20 = vadd.f32 %v549_v14, %v418_v7 }
 0x1ef   :  { %v588_v32 = vsel %vm578_vm3, %v2831_v22, -inf }
 0x1f0   :  { %v2203_v23 = vpop.f32.mrb[20].mxu1  ;;  %v585_v24 = vsel %vm578_vm3, %v2826_v20, -inf }
 0x1f1   :  { %v559_v27 = vpop.f32.mrb[21].mxu1  ;;  %586 = vmax.xlane.f32.xlu1 %v585_v24  ;;  %583 = vmax.xlane.f32.xlu0 %v582_v25  ;;  %v2845_v30 = vadd.f32 %v2203_v23, %v421_v26 }
 0x1f2   :  { %v2840_v28 = vadd.f32 %v559_v27, %v420_v21 }
 0x1f3   :  { %v594_v39 = vsel %vm578_vm3, %v2845_v30, -inf }
 0x1f4   :  { %v2206_v31 = vpop.f32.mrb[22].mxu1  ;;  %v591_v33 = vsel %vm578_vm3, %v2840_v28, -inf }
 0x1f5   :  { %v569_v36 = vpop.f32.mrb[23].mxu1  ;;  %589 = vmax.xlane.f32.xlu1 %v588_v32  ;;  %592 = vmax.xlane.f32.xlu0 %v591_v33  ;;  %v2856_v38 = vadd.f32 %v2206_v31, %v423_v34 }
 0x1f6   :  { %v2854_v37 = vadd.f32 %v569_v36, %v422_v29 }
 0x1f7   :  { %v600_v41 = vsel %vm578_vm3, %v2856_v38, -inf }
 0x1f8   :  { %v597_v40 = vsel %vm578_vm3, %v2854_v37, -inf }
 0x1f9   :  { %595 = vmax.xlane.f32.xlu1 %v594_v39  ;;  %598 = vmax.xlane.f32.xlu0 %v597_v40 }
 0x1fd   :  { %601 = vmax.xlane.f32.xlu1 %v600_v41 }
 0x27a   :  { %v581_v59 = vpop.xlane.xlu0 %580 }
 0x27b   :  { %v603_v60 = vsub.f32 %v2814_v6, %v581_v59  ;;  %v2265_v59 = vpop.f32.mrb[24].mxu1 }
 0x27c   :  { %v1001_v48 = vadd.f32 %v2265_v59, %v2952_v58 }
 0x27d   :  { %v611_v61 = vmul.f32 1.442695, %v603_v60  ;;  %v995_v60 = vpop.f32.mrb[25].mxu1 }
 0x27e   :  { %v587_v62 = vpop.xlane.xlu1 %586  ;;  %v584_v63 = vpop.xlane.xlu0 %583 }
 0x27f   :  { %2527 = vpow2.f32 %v611_v61  ;;  %v605_v0 = vsub.f32 %v2826_v20, %v587_v62  ;;  %v604_v1 = vsub.f32 %v2819_v8, %v584_v63  ;;  %v996_v61 = vadd.f32 %v2952_v58, %v995_v60  ;;  %v2268_v63 = vpop.f32.mrb[26].mxu1 }
 0x281   :  { %v615_v2 = vmul.f32 1.442695, %v605_v0  ;;  %v613_v3 = vmul.f32 1.442695, %v604_v1  ;;  %v2471_v62 = vpack.c.bf16 %v1001_v48, %v996_v61  ;;  %v1011_v0 = vadd.f32 %v2268_v63, %v2952_v58  ;;  %v1005_v1 = vpop.f32.mrb[27].mxu1 }
 0x282   :  { %v590_v4 = vpop.xlane.xlu1 %589  ;;  %v593_v7 = vpop.xlane.xlu0 %592 }
 0x283   :  { %2529 = vpow2.f32 %v615_v2  ;;  %v606_v9 = vsub.f32 %v2831_v22, %v590_v4  ;;  %v607_v10 = vsub.f32 %v2840_v28, %v593_v7  ;;  %2473 = vmatprep.subr.msk.bf16.mxu1 %vm2753_vm2, %v2471_v62  ;;  %v1006_v2 = vadd.f32 %v2952_v58, %v1005_v1  ;;  %v2271_v4 = vpop.f32.mrb[28].mxu1 }
 0x284   :  { %2531 = vpow2.f32 %v613_v3  ;;  %2476 = vmatpush3.bf16.xpose.msk.msra.mxu1 %vm2753_vm2, %v2471_v62  ;;  %v1021_v7 = vadd.f32 %v2271_v4, %v2952_v58 }
 0x285   :  { %v617_v11 = vmul.f32 1.442695, %v606_v9  ;;  %v619_v6 = vmul.f32 1.442695, %v607_v10  ;;  %v2477_v3 = vpack.c.bf16 %v1011_v0, %v1006_v2  ;;  %v1015_v9 = vpop.f32.mrb[29].mxu1 }
 0x286   :  { %v596_v14 = vpop.xlane.xlu1 %595  ;;  %v599_v21 = vpop.xlane.xlu0 %598  ;;  %v1016_v10 = vadd.f32 %v2952_v58, %v1015_v9 }
 0x287   :  { %2533 = vpow2.f32 %v617_v11  ;;  %v608_v23 = vsub.f32 %v2845_v30, %v596_v14  ;;  %v609_v20 = vsub.f32 %v2854_v37, %v599_v21  ;;  %2479 = vmatprep.subr.msk.bf16.mxu1 %vm2753_vm2, %v2477_v3 }
 0x288   :  { %2535 = vpow2.f32 %v619_v6  ;;  %v2483_v11 = vpack.c.bf16 %v1021_v7, %v1016_v10 }
 0x289   :  { %v2906_v8 = vpop.eup %2527  ;;  %v621_v24 = vmul.f32 1.442695, %v608_v23  ;;  %v623_v25 = vmul.f32 1.442695, %v609_v20 }
 0x28a   :  { %v602_v26 = vpop.xlane.xlu1 %601  ;;  %v627_v22 = vsel %vm578_vm3, %v2906_v8, 0.0 }
 0x28b   :  { %2537 = vpow2.f32 %v621_v24  ;;  %v610_v27 = vsub.f32 %v2856_v38, %v602_v26  ;;  %628 = vadd.xlane.f32.xlu0 %v627_v22 }
 0x28c   :  { %2539 = vpow2.f32 %v623_v25  ;;  %2482 = vmatpush3.bf16.xpose.msk.msra.mxu1 %vm2753_vm2, %v2477_v3 }
 0x28d   :  { %v2911_v28 = vpop.eup %2529  ;;  %v625_v29 = vmul.f32 1.442695, %v610_v27  ;;  %2485 = vmatprep.subr.msk.bf16.mxu1 %vm2753_vm2, %v2483_v11  ;;  %v1872_v27 = vld [vmem:[%s3207_s1 + $0x30] sm:$0xff] }
 0x28e   :  { %v2913_v30 = vpop.eup %2531  ;;  %v633_v31 = vsel %vm578_vm3, %v2911_v28, 0.0 }
 0x28f   :  { %2541 = vpow2.f32 %v625_v29  ;;  %634 = vadd.xlane.f32.xlu0 %v633_v31  ;;  %v630_v32 = vsel %vm578_vm3, %v2913_v30, 0.0  ;;  %v1873_v29 = vld [vmem:[%s3207_s1 + $0x38] sm:$0xff] }
 0x290   :  { %631 = vadd.xlane.f32.xlu1 %v630_v32 }
 0x291   :  { %v2919_v33 = vpop.eup %2533 }
 0x292   :  { %v2921_v34 = vpop.eup %2535  ;;  %v636_v36 = vsel %vm578_vm3, %v2919_v33, 0.0 }
 0x293   :  { %v639_v37 = vsel %vm578_vm3, %v2921_v34, 0.0 }
 0x294   :  { %637 = vadd.xlane.f32.xlu1 %v636_v36  ;;  %640 = vadd.xlane.f32.xlu0 %v639_v37 }
 0x295   :  { %v2927_v38 = vpop.eup %2537  ;;  %2488 = vmatpush3.bf16.xpose.msk.msra.mxu1 %vm2753_vm2, %v2483_v11 }
 0x296   :  { %v2929_v39 = vpop.eup %2539  ;;  %v642_v40 = vsel %vm578_vm3, %v2927_v38, 0.0 }
 0x297   :  { %v645_v41 = vsel %vm578_vm3, %v2929_v39, 0.0 }
 0x298   :  { %643 = vadd.xlane.f32.xlu1 %v642_v40  ;;  %646 = vadd.xlane.f32.xlu0 %v645_v41  ;;  %v2451_v40 = vpack.c.bf16 %v1873_v29, %v1872_v27 }
 0x299   :  { %v2935_v42 = vpop.eup %2541 }
 0x29a   :  { %v648_v44 = vsel %vm578_vm3, %v2935_v42, 0.0 }
 0x29c   :  { %649 = vadd.xlane.f32.xlu1 %v648_v44 }
 0x318   :  { %v629_v6 = vpop.xlane.xlu0 %628 }
 0x319   :  { %2543 = vrcp.f32 %v629_v6  ;;  %v1898_v6 = vld [vmem:[%s3212_s3 + $0x20] sm:$0xff] }
 0x31c   :  { %v635_v14 = vpop.xlane.xlu0 %634 }
 0x31d   :  { %v632_v21 = vpop.xlane.xlu1 %631  ;;  %2545 = vrcp.f32 %v635_v14  ;;  %v1899_v14 = vld [vmem:[%s3212_s3 + $0x28] sm:$0xff] }
 0x31e   :  { %2547 = vrcp.f32 %v632_v21  ;;  %v1900_v21 = vld [vmem:[%s3212_s3 + $0x30] sm:$0xff] }
 0x321   :  { %v638_v23 = vpop.xlane.xlu1 %637  ;;  %v641_v20 = vpop.xlane.xlu0 %640 }
 0x322   :  { %2549 = vrcp.f32 %v638_v23  ;;  %v2463_v23 = vpack.c.bf16 %v1899_v14, %v1898_v6 }
 0x323   :  { %v2544_v24 = vpop.eup %2543  ;;  %2551 = vrcp.f32 %v641_v20  ;;  %v1901_v20 = vld [vmem:[%s3212_s3 + $0x38] sm:$0xff] }
 0x324   :  { %v659_v25 = vmul.f32 %v2544_v24, %v2906_v8  ;;  %v2467_v24 = vpack.c.bf16 %v1901_v20, %v1900_v21 }
 0x325   :  { %v644_v26 = vpop.xlane.xlu1 %643  ;;  %v647_v22 = vpop.xlane.xlu0 %646 }
 0x326   :  { %2553 = vrcp.f32 %v644_v26  ;;  %2223 = vmatprep.mubr.msk.f32.mxu0 %vm578_vm3, %v659_v25 }
 0x327   :  { %v2546_v31 = vpop.eup %2545  ;;  %2555 = vrcp.f32 %v647_v22 }
 0x328   :  { %v2548_v32 = vpop.eup %2547  ;;  %v661_v36 = vmul.f32 %v2546_v31, %v2911_v28 }
 0x329   :  { %v660_v8 = vmul.f32 %v2548_v32, %v2913_v30  ;;  %v650_v37 = vpop.xlane.xlu1 %649 }
 0x32a   :  { %2557 = vrcp.f32 %v650_v37  ;;  %v1916_v37 = vld [vmem:[%s3213_s7 + $0x60] sm:$0xff] }
 0x32b   :  { %2224 = vmatmul.mubr.msk.f32.vlgmr.msra.gmra.mrb[8].mxu0 %vm578_vm3, %v660_v8 }
 0x32c   :  { %v2550_v41 = vpop.eup %2549  ;;  %2226 = vmatprep.mubr.msk.f32.mxu0 %vm578_vm3, %v661_v36  ;;  %2450 = vmatpush3.bf16.msra.mxu0 %v2447_v57  ;;  %v1917_v36 = vld [vmem:[%s3213_s7 + $0x68] sm:$0xff] }
 0x32d   :  { %v2552_v43 = vpop.eup %2551  ;;  %v662_v44 = vmul.f32 %v2550_v41, %v2919_v33  ;;  %2452 = vmatprep.subr.bf16.mxu0 %v2451_v40 }
 0x32e   :  { %v663_v45 = vmul.f32 %v2552_v43, %v2921_v34  ;;  %v2274_v34 = vpop.f32.mrb[30].mxu1 }
 0x32f   :  { %2227 = vmatmul.mubr.msk.f32.gmra.mrb[10].mxu0 %vm578_vm3, %v662_v44 }
 0x330   :  { %v2554_v28 = vpop.eup %2553  ;;  %2229 = vmatprep.mubr.msk.f32.mxu0 %vm578_vm3, %v663_v45  ;;  %2454 = vmatpush3.bf16.msra.mxu0 %v2451_v40 }
 0x331   :  { %v2556_v30 = vpop.eup %2555  ;;  %v664_v46 = vmul.f32 %v2554_v28, %v2927_v38  ;;  %v1031_v38 = vadd.f32 %v2274_v34, %v2952_v58  ;;  %2464 = vmatprep.subr.bf16.mxu0 %v2463_v23  ;;  %v1919_v28 = vld [vmem:[%s3213_s7 + $0x78] sm:$0xff] }
 0x332   :  { %v665_v47 = vmul.f32 %v2556_v30, %v2929_v39  ;;  %v1025_v39 = vpop.f32.mrb[31].mxu1 }
 0x333   :  { %2230 = vmatmul.mubr.msk.f32.gmra.mrb[12].mxu0 %vm578_vm3, %v664_v46  ;;  %v1918_v46 = vld [vmem:[%s3213_s7 + $0x70] sm:$0xff] }
 0x334   :  { %v2558_v49 = vpop.eup %2557  ;;  %2232 = vmatprep.mubr.msk.f32.mxu0 %vm578_vm3, %v665_v47 }
 0x335   :  { %v666_v33 = vmul.f32 %v2558_v49, %v2935_v42  ;;  %v1026_v42 = vadd.f32 %v2952_v58, %v1025_v39 }
 0x337   :  { %2233 = vmatmul.mubr.msk.f32.gmra.mrb[14].mxu0 %vm578_vm3, %v666_v33  ;;  %v2489_v50 = vpack.c.bf16 %v1031_v38, %v1026_v42 }
 0x338   :  { %2243 = vmatprep.mubr.msk.f32.mxu0 %vm54_vm0, %v2661_v5 }
 0x339   :  { %2491 = vmatprep.subr.msk.bf16.mxu1 %vm2753_vm2, %v2489_v50 }
 0x33a   :  { %2494 = vmatpush3.bf16.xpose.msk.msra.mxu1 %vm2753_vm2, %v2489_v50  ;;  %v3106_v50 = vld [vmem:[%s3214_s6 + $0x1] ss:$0 sm:$0xff] }
 0x33b   :  { %2244 = vmatmul.mubr.msk.f32.vlgmr.msra.gmra.mrb[16].mxu0 %vm54_vm0, %v2682_v12 }
 0x33c   :  { %2246 = vmatprep.mubr.msk.f32.mxu0 %vm54_vm0, %v2687_v13  ;;  %2466 = vmatpush3.bf16.msra.mxu0 %v2463_v23 }
 0x33d   :  { %2468 = vmatprep.subr.bf16.mxu0 %v2467_v24 }
 0x33f   :  { %2247 = vmatmul.mubr.msk.f32.gmra.mrb[18].mxu0 %vm54_vm0, %v2696_v15 }
 0x340   :  { %2249 = vmatprep.mubr.msk.f32.mxu0 %vm54_vm0, %v2701_v16  ;;  %2470 = vmatpush3.bf16.msra.mxu0 %v2467_v24 }
 0x343   :  { %2250 = vmatmul.mubr.msk.f32.gmra.mrb[20].mxu0 %vm54_vm0, %v2710_v17 }
 0x344   :  { %2252 = vmatprep.mubr.msk.f32.mxu0 %vm54_vm0, %v2715_v18 }
 0x347   :  { %2253 = vmatmul.mubr.msk.f32.gmra.mrb[22].mxu0 %vm54_vm0, %v2724_v19 }
 0x348   :  { %2283 = vmatprep.mubr.msk.f32.mxu0 %vm54_vm0, %v2661_v5 }
 0x34b   :  { %2284 = vmatmul.mubr.msk.f32.vlgmr.msra.gmra.mrb[24].mxu0 %vm54_vm0, %v2682_v12  ;;  %v1913_v12 = vld [vmem:[%s3213_s7 + $0x48] sm:$0xff] }
 0x34c   :  { %2286 = vmatprep.mubr.msk.f32.mxu0 %vm54_vm0, %v2687_v13  ;;  %v1912_v13 = vld [vmem:[%s3213_s7 + $0x40] sm:$0xff] }
 0x34f   :  { %2287 = vmatmul.mubr.msk.f32.gmra.mrb[26].mxu0 %vm54_vm0, %v2696_v15 }
 0x350   :  { %2289 = vmatprep.mubr.msk.f32.mxu0 %vm54_vm0, %v2701_v16 }
 0x353   :  { %2290 = vmatmul.mubr.msk.f32.gmra.mrb[28].mxu0 %vm54_vm0, %v2710_v17  ;;  %v1915_v17 = vld [vmem:[%s3213_s7 + $0x58] sm:$0xff] }
 0x354   :  { %2292 = vmatprep.mubr.msk.f32.mxu0 %vm54_vm0, %v2715_v18 }
 0x357   :  { %2293 = vmatmul.mubr.msk.f32.gmra.mrb[30].mxu0 %vm54_vm0, %v2724_v19  ;;  %v1914_v19 = vld [vmem:[%s3213_s7 + $0x50] sm:$0xff] }
 0x3fe   :  { %v3018_v51 = vpop.f32.mrb[8].mxu0 }
 0x3ff   :  { %v3020_v52 = vpop.f32.mrb[9].mxu0 }
 0x402   :  { %v3022_v53 = vpop.f32.mrb[10].mxu0 }
 0x403   :  { %v3024_v5 = vpop.f32.mrb[11].mxu0 }
 0x406   :  { %v3026_v54 = vpop.f32.mrb[12].mxu0 }
 0x407   :  { %v3028_v55 = vpop.f32.mrb[13].mxu0 }
 0x40a   :  { %v3030_v56 = vpop.f32.mrb[14].mxu0 }
 0x40b   :  { %v3032_v57 = vpop.f32.mrb[15].mxu0 }
 0x40e   :  { %v2245_v58 = vpop.f32.mrb[16].mxu0 }
 0x40f   :  { %v877_v59 = vpop.f32.mrb[17].mxu0  ;;  %v883_v60 = vadd.f32 %v2245_v58, %v1875_v35 }
 0x410   :  { %v878_v48 = vadd.f32 %v1875_v35, %v877_v59 }
 0x412   :  { %v2248_v61 = vpop.f32.mrb[18].mxu0  ;;  %2311 = vmatprep.mubr.msk.f32.mxu1 %vm424_vm1, %v878_v48 }
 0x413   :  { %v887_v62 = vpop.f32.mrb[19].mxu0  ;;  %2312 = vmatmul.mubr.msk.f32.vlgmr.msra.gmra.mrb[32].mxu1 %vm424_vm1, %v883_v60  ;;  %v893_v0 = vadd.f32 %v2248_v61, %v1875_v35 }
 0x414   :  { %v888_v63 = vadd.f32 %v1875_v35, %v887_v62 }
 0x416   :  { %v2251_v1 = vpop.f32.mrb[20].mxu0  ;;  %2314 = vmatprep.mubr.msk.f32.mxu1 %vm424_vm1, %v888_v63 }
 0x417   :  { %v897_v2 = vpop.f32.mrb[21].mxu0  ;;  %2315 = vmatmul.mubr.msk.f32.gmra.mrb[34].mxu1 %vm424_vm1, %v893_v0  ;;  %v903_v4 = vadd.f32 %v2251_v1, %v1875_v35 }
 0x418   :  { %v898_v3 = vadd.f32 %v1875_v35, %v897_v2 }
 0x41a   :  { %v2254_v7 = vpop.f32.mrb[22].mxu0  ;;  %2317 = vmatprep.mubr.msk.f32.mxu1 %vm424_vm1, %v898_v3 }
 0x41b   :  { %v907_v9 = vpop.f32.mrb[23].mxu0  ;;  %2318 = vmatmul.mubr.msk.f32.gmra.mrb[36].mxu1 %vm424_vm1, %v903_v4  ;;  %v913_v11 = vadd.f32 %v2254_v7, %v1875_v35 }
 0x41c   :  { %v908_v10 = vadd.f32 %v1875_v35, %v907_v9 }
 0x41e   :  { %2320 = vmatprep.mubr.msk.f32.mxu1 %vm424_vm1, %v908_v10  ;;  %v2285_v35 = vpop.f32.mrb[24].mxu0 }
 0x41f   :  { %2321 = vmatmul.mubr.msk.f32.gmra.mrb[38].mxu1 %vm424_vm1, %v913_v11  ;;  %v1119_v58 = vadd.f32 %v2285_v35, %v3106_v50  ;;  %v1113_v59 = vpop.f32.mrb[25].mxu0 }
 0x420   :  { %v1114_v48 = vadd.f32 %v3106_v50, %v1113_v59 }
 0x422   :  { %v2495_v60 = vpack.c.bf16 %v1119_v58, %v1114_v48  ;;  %v2288_v61 = vpop.f32.mrb[26].mxu0 }
 0x423   :  { %v1129_v62 = vadd.f32 %v2288_v61, %v3106_v50  ;;  %v1123_v63 = vpop.f32.mrb[27].mxu0  ;;  %v1944_v61 = vld [vmem:[%s3215_s8 + $0x10] sm:$0xff] }
 0x424   :  { %v1124_v0 = vadd.f32 %v3106_v50, %v1123_v63  ;;  %2496 = vmatprep.subr.bf16.mxu0 %v2495_v60 }
 0x425   :  { %2498 = vmatpush3.bf16.msra.mxu0 %v2495_v60 }
 0x426   :  { %v2499_v1 = vpack.c.bf16 %v1129_v62, %v1124_v0  ;;  %v2291_v2 = vpop.f32.mrb[28].mxu0  ;;  %v1945_v62 = vld [vmem:[%s3215_s8 + $0x18] sm:$0xff] }
 0x427   :  { %v2511_v63 = vpack.c.bf16 %v1945_v62, %v1944_v61 }
 0x428   :  { %2500 = vmatprep.subr.bf16.mxu0 %v2499_v1 }
 0x429   :  { %2502 = vmatpush3.bf16.msra.mxu0 %v2499_v1 }
 0x4e6   :  { %v2313_v15 = vpop.f32.mrb[32].mxu1 }
 0x4e7   :  { %v1281_v25 = vadd.f32 %v2313_v15, %v1913_v12  ;;  %v1275_v16 = vpop.f32.mrb[33].mxu1 }
 0x4e8   :  { %v1276_v26 = vadd.f32 %v1912_v13, %v1275_v16 }
 0x4e9   :  { %v1317_v18 = vsel %vm578_vm3, %v1281_v25, -inf }
 0x4ea   :  { %1318 = vmax.xlane.f32.xlu1 %v1317_v18  ;;  %v2316_v22 = vpop.f32.mrb[34].mxu1  ;;  %v1314_v27 = vsel %vm578_vm3, %v1276_v26, -inf }
 0x4eb   :  { %v1291_v29 = vadd.f32 %v2316_v22, %v1915_v17  ;;  %v1285_v31 = vpop.f32.mrb[35].mxu1  ;;  %1315 = vmax.xlane.f32.xlu0 %v1314_v27 }
 0x4ec   :  { %v1286_v32 = vadd.f32 %v1914_v19, %v1285_v31 }
 0x4ed   :  { %v1323_v8 = vsel %vm578_vm3, %v1291_v29, -inf }
 0x4ee   :  { %1324 = vmax.xlane.f32.xlu1 %v1323_v8  ;;  %v2319_v40 = vpop.f32.mrb[36].mxu1  ;;  %v1320_v41 = vsel %vm578_vm3, %v1286_v32, -inf }
 0x4ef   :  { %v1301_v43 = vadd.f32 %v2319_v40, %v1917_v36  ;;  %v1295_v44 = vpop.f32.mrb[37].mxu1  ;;  %1321 = vmax.xlane.f32.xlu0 %v1320_v41 }
 0x4f0   :  { %v1296_v45 = vadd.f32 %v1916_v37, %v1295_v44 }
 0x4f1   :  { %v1329_v30 = vsel %vm578_vm3, %v1301_v43, -inf }
 0x4f2   :  { %1330 = vmax.xlane.f32.xlu1 %v1329_v30  ;;  %v2322_v47 = vpop.f32.mrb[38].mxu1  ;;  %v1326_v49 = vsel %vm578_vm3, %v1296_v45, -inf }
 0x4f3   :  { %v1311_v33 = vadd.f32 %v2322_v47, %v1919_v28  ;;  %v1305_v34 = vpop.f32.mrb[39].mxu1  ;;  %1327 = vmax.xlane.f32.xlu0 %v1326_v49 }
 0x4f4   :  { %v1306_v38 = vadd.f32 %v1918_v46, %v1305_v34  ;;  %v1139_v34 = vadd.f32 %v2291_v2, %v3106_v50 }
 0x4f5   :  { %v1335_v39 = vsel %vm578_vm3, %v1311_v33, -inf }
 0x4f6   :  { %1336 = vmax.xlane.f32.xlu1 %v1335_v39  ;;  %v1332_v42 = vsel %vm578_vm3, %v1306_v38, -inf }
 0x4f7   :  { %1333 = vmax.xlane.f32.xlu0 %v1332_v42 }
 0x577   :  { %v1319_v3 = vpop.xlane.xlu1 %1318 }
 0x578   :  { %v1339_v4 = vsub.f32 %v1281_v25, %v1319_v3  ;;  %v1316_v7 = vpop.xlane.xlu0 %1315 }
 0x579   :  { %v1338_v9 = vsub.f32 %v1276_v26, %v1316_v7 }
 0x57a   :  { %v1348_v10 = vmul.f32 1.442695, %v1339_v4 }
 0x57b   :  { %v1346_v11 = vmul.f32 1.442695, %v1338_v9  ;;  %v1325_v6 = vpop.xlane.xlu1 %1324 }
 0x57c   :  { %2559 = vpow2.f32 %v1348_v10  ;;  %v1341_v14 = vsub.f32 %v1291_v29, %v1325_v6  ;;  %v1322_v21 = vpop.xlane.xlu0 %1321 }
 0x57d   :  { %2561 = vpow2.f32 %v1346_v11  ;;  %v1340_v23 = vsub.f32 %v1286_v32, %v1322_v21 }
 0x57e   :  { %v1352_v20 = vmul.f32 1.442695, %v1341_v14 }
 0x57f   :  { %v1350_v24 = vmul.f32 1.442695, %v1340_v23  ;;  %v1331_v12 = vpop.xlane.xlu1 %1330 }
 0x580   :  { %2563 = vpow2.f32 %v1352_v20  ;;  %v1343_v13 = vsub.f32 %v1301_v43, %v1331_v12  ;;  %v1328_v15 = vpop.xlane.xlu0 %1327 }
 0x581   :  { %2565 = vpow2.f32 %v1350_v24  ;;  %v1342_v16 = vsub.f32 %v1296_v45, %v1328_v15 }
 0x582   :  { %v1356_v17 = vmul.f32 1.442695, %v1343_v13 }
 0x583   :  { %v1354_v25 = vmul.f32 1.442695, %v1342_v16  ;;  %v1337_v18 = vpop.xlane.xlu1 %1336 }
 0x584   :  { %2567 = vpow2.f32 %v1356_v17  ;;  %v1345_v26 = vsub.f32 %v1311_v33, %v1337_v18  ;;  %v1334_v19 = vpop.xlane.xlu0 %1333 }
 0x585   :  { %2569 = vpow2.f32 %v1354_v25  ;;  %v1344_v22 = vsub.f32 %v1306_v38, %v1334_v19  ;;  %v1133_v38 = vpop.f32.mrb[29].mxu0  ;;  %v796_v19 = vld [vmem:[%s3215_s8] sm:$0xff] }
 0x586   :  { %v3112_v27 = vpop.eup %2559  ;;  %v1360_v29 = vmul.f32 1.442695, %v1345_v26  ;;  %v1134_v39 = vadd.f32 %v3106_v50, %v1133_v38  ;;  %v2294_v35 = vpop.f32.mrb[30].mxu0 }
 0x587   :  { %v2562_v31 = vpop.eup %2561  ;;  %v1358_v32 = vmul.f32 1.442695, %v1344_v22  ;;  %v1365_v36 = vsel %vm578_vm3, %v3112_v27, 0.0  ;;  %v1143_v58 = vpop.f32.mrb[31].mxu0  ;;  %v1149_v59 = vadd.f32 %v2294_v35, %v3106_v50  ;;  %v797_v22 = vld [vmem:[%s3215_s8 + $0x8] sm:$0xff] }
 0x588   :  { %2571 = vpow2.f32 %v1360_v29  ;;  %1366 = vadd.xlane.f32.xlu1 %v1365_v36  ;;  %v1362_v8 = vsel %vm578_vm3, %v2562_v31, 0.0  ;;  %v2503_v42 = vpack.c.bf16 %v1139_v34, %v1134_v39  ;;  %v1144_v48 = vadd.f32 %v3106_v50, %v1143_v58 }
 0x589   :  { %2573 = vpow2.f32 %v1358_v32  ;;  %1363 = vadd.xlane.f32.xlu0 %v1362_v8 }
 0x58a   :  { %v2564_v37 = vpop.eup %2563  ;;  %2504 = vmatprep.subr.bf16.mxu0 %v2503_v42  ;;  %v2507_v60 = vpack.c.bf16 %v1149_v59, %v1144_v48 }
 0x58b   :  { %v2566_v40 = vpop.eup %2565  ;;  %v1371_v41 = vsel %vm578_vm3, %v2564_v37, 0.0  ;;  %2506 = vmatpush3.bf16.msra.mxu0 %v2503_v42 }
 0x58c   :  { %1372 = vadd.xlane.f32.xlu1 %v1371_v41  ;;  %v1368_v43 = vsel %vm578_vm3, %v2566_v40, 0.0  ;;  %2508 = vmatprep.subr.bf16.mxu0 %v2507_v60 }
 0x58d   :  { %1369 = vadd.xlane.f32.xlu0 %v1368_v43 }
 0x58e   :  { %v2568_v44 = vpop.eup %2567 }
 0x58f   :  { %v2570_v45 = vpop.eup %2569  ;;  %v1377_v28 = vsel %vm578_vm3, %v2568_v44, 0.0  ;;  %2510 = vmatpush3.bf16.msra.mxu0 %v2507_v60 }
 0x590   :  { %1378 = vadd.xlane.f32.xlu1 %v1377_v28  ;;  %v1374_v30 = vsel %vm578_vm3, %v2570_v45, 0.0  ;;  %2512 = vmatprep.subr.bf16.mxu0 %v2511_v63 }
 0x591   :  { %1375 = vadd.xlane.f32.xlu0 %v1374_v30 }
 0x592   :  { %v2572_v46 = vpop.eup %2571 }
 0x593   :  { %v2574_v47 = vpop.eup %2573  ;;  %v1383_v49 = vsel %vm578_vm3, %v2572_v46, 0.0 }
 0x594   :  { %1384 = vadd.xlane.f32.xlu1 %v1383_v49  ;;  %v1380_v33 = vsel %vm578_vm3, %v2574_v47, 0.0 }
 0x595   :  { %1381 = vadd.xlane.f32.xlu0 %v1380_v33 }
 0x615   :  { %v1367_v0 = vpop.xlane.xlu1 %1366 }
 0x616   :  { %2575 = vrcp.f32 %v1367_v0  ;;  %v1364_v1 = vpop.xlane.xlu0 %1363 }
 0x617   :  { %2577 = vrcp.f32 %v1364_v1 }
 0x619   :  { %v1373_v50 = vpop.xlane.xlu1 %1372 }
 0x61a   :  { %2579 = vrcp.f32 %v1373_v50  ;;  %v1370_v2 = vpop.xlane.xlu0 %1369 }
 0x61b   :  { %2581 = vrcp.f32 %v1370_v2 }
 0x61d   :  { %v1379_v3 = vpop.xlane.xlu1 %1378 }
 0x61e   :  { %2583 = vrcp.f32 %v1379_v3  ;;  %v1376_v4 = vpop.xlane.xlu0 %1375 }
 0x61f   :  { %2585 = vrcp.f32 %v1376_v4 }
 0x620   :  { %v2576_v7 = vpop.eup %2575 }
 0x621   :  { %v2578_v9 = vpop.eup %2577  ;;  %v1385_v10 = vpop.xlane.xlu1 %1384  ;;  %v1395_v14 = vmul.f32 %v2576_v7, %v3112_v27  ;;  %v2515_v27 = vpack.c.bf16 %v797_v22, %v796_v19 }
 0x622   :  { %2587 = vrcp.f32 %v1385_v10  ;;  %v1382_v11 = vpop.xlane.xlu0 %1381  ;;  %v1394_v6 = vmul.f32 %v2578_v9, %v2562_v31 }
 0x623   :  { %2589 = vrcp.f32 %v1382_v11 }
 0x624   :  { %v2580_v21 = vpop.eup %2579  ;;  %2339 = vmatprep.mubr.msk.f32.mxu0 %vm578_vm3, %v1394_v6 }
 0x625   :  { %v2582_v23 = vpop.eup %2581  ;;  %2340 = vmatmul.mubr.msk.f32.vlgmr.msra.gmra.mrb[32].mxu0 %vm578_vm3, %v1395_v14  ;;  %v1397_v24 = vmul.f32 %v2580_v21, %v2564_v37 }
 0x626   :  { %v1396_v20 = vmul.f32 %v2582_v23, %v2566_v40  ;;  %2514 = vmatpush3.bf16.msra.mxu0 %v2511_v63 }
 0x627   :  { %2516 = vmatprep.subr.bf16.mxu0 %v2515_v27 }
 0x628   :  { %v2584_v12 = vpop.eup %2583  ;;  %2342 = vmatprep.mubr.msk.f32.mxu0 %vm578_vm3, %v1396_v20 }
 0x629   :  { %v2586_v13 = vpop.eup %2585  ;;  %2343 = vmatmul.mubr.msk.f32.gmra.mrb[34].mxu0 %vm578_vm3, %v1397_v24  ;;  %v1399_v16 = vmul.f32 %v2584_v12, %v2568_v44 }
 0x62a   :  { %v1398_v15 = vmul.f32 %v2586_v13, %v2570_v45 }
 0x62c   :  { %v2588_v17 = vpop.eup %2587  ;;  %2345 = vmatprep.mubr.msk.f32.mxu0 %vm578_vm3, %v1398_v15 }
 0x62d   :  { %v2590_v25 = vpop.eup %2589  ;;  %2346 = vmatmul.mubr.msk.f32.gmra.mrb[36].mxu0 %vm578_vm3, %v1399_v16  ;;  %v1401_v26 = vmul.f32 %v2588_v17, %v2572_v46 }
 0x62e   :  { %v1400_v18 = vmul.f32 %v2590_v25, %v2574_v47 }
 0x630   :  { %2348 = vmatprep.mubr.msk.f32.mxu0 %vm578_vm3, %v1400_v18 }
 0x631   :  { %2349 = vmatmul.mubr.msk.f32.gmra.mrb[38].mxu0 %vm578_vm3, %v1401_v26 }
 0x6f8   :  { %v2341_v29 = vpop.f32.mrb[32].mxu0 }
 0x6f9   :  { %v1492_v31 = vpop.f32.mrb[33].mxu0 }
 0x6fa   :  { %2355 = vmatprep.mubr.msk.f32.mxu0 %vm424_vm1, %v1492_v31 }
 0x6fb   :  { %2356 = vmatmul.mubr.msk.f32.vlgmr.msra.gmra.mrb[40].mxu0 %vm424_vm1, %v2341_v29 }
 0x6fc   :  { %v2344_v32 = vpop.f32.mrb[34].mxu0  ;;  %2518 = vmatpush3.bf16.msra.mxu0 %v2515_v27 }
 0x6fd   :  { %v1502_v36 = vpop.f32.mrb[35].mxu0 }
 0x6fe   :  { %2358 = vmatprep.mubr.msk.f32.mxu0 %vm424_vm1, %v1502_v36 }
 0x6ff   :  { %2359 = vmatmul.mubr.msk.f32.gmra.mrb[42].mxu0 %vm424_vm1, %v2344_v32 }
 0x700   :  { %v2347_v8 = vpop.f32.mrb[36].mxu0 }
 0x701   :  { %v1512_v37 = vpop.f32.mrb[37].mxu0 }
 0x702   :  { %2361 = vmatprep.mubr.msk.f32.mxu0 %vm424_vm1, %v1512_v37 }
 0x703   :  { %2362 = vmatmul.mubr.msk.f32.gmra.mrb[44].mxu0 %vm424_vm1, %v2347_v8 }
 0x704   :  { %v2350_v40 = vpop.f32.mrb[38].mxu0 }
 0x705   :  { %v1522_v41 = vpop.f32.mrb[39].mxu0 }
 0x706   :  { %2364 = vmatprep.mubr.msk.f32.mxu0 %vm424_vm1, %v1522_v41 }
 0x707   :  { %2365 = vmatmul.mubr.msk.f32.gmra.mrb[46].mxu0 %vm424_vm1, %v2350_v40 }
 0x708   :  { %2371 = vmatprep.mubr.msk.f32.mxu0 %vm424_vm1, %v3020_v52 }
 0x70b   :  { %2372 = vmatmul.mubr.msk.f32.vlgmr.msra.gmra.mrb[40].mxu0 %vm424_vm1, %v3018_v51  ;;  %v1962_v51 = vld [vmem:[%s3216_s9] ss:$0 sm:$0xff] }
 0x70c   :  { %2374 = vmatprep.mubr.msk.f32.mxu0 %vm424_vm1, %v3024_v5 }
 0x70f   :  { %2375 = vmatmul.mubr.msk.f32.gmra.mrb[42].mxu0 %vm424_vm1, %v3022_v53 }
 0x710   :  { %2377 = vmatprep.mubr.msk.f32.mxu0 %vm424_vm1, %v3028_v55 }
 0x713   :  { %2378 = vmatmul.mubr.msk.f32.gmra.mrb[44].mxu0 %vm424_vm1, %v3026_v54 }
 0x714   :  { %2380 = vmatprep.mubr.msk.f32.mxu0 %vm424_vm1, %v3032_v57 }
 0x717   :  { %2381 = vmatmul.mubr.msk.f32.gmra.mrb[46].mxu0 %vm424_vm1, %v3030_v56 }
 0x7de   :  { %v2373_v52 = vpop.f32.mrb[40].mxu0 }
 0x7df   :  { %v1800_v5 = vadd.f32 %v2373_v52, %v1962_v51  ;;  %v1753_v43 = vpop.f32.mrb[41].mxu0 }
 0x7e0   :  { %v1799_v53 = vadd.f32 %v1962_v51, %v1753_v43 }
 0x7e1   :  { %1808 = vst.msk [vmem:[%s3217_s10 + $0x8] sm:$0xff] %vm54_vm0, %v1800_v5 }
 0x7e2   :  { %1807 = vst.msk [vmem:[%s3217_s10] sm:$0xff] %vm54_vm0, %v1799_v53  ;;  %v2376_v54 = vpop.f32.mrb[42].mxu0 }
 0x7e3   :  { %v1802_v55 = vadd.f32 %v2376_v54, %v1962_v51  ;;  %v1763_v56 = vpop.f32.mrb[43].mxu0 }
 0x7e4   :  { %v1801_v57 = vadd.f32 %v1962_v51, %v1763_v56 }
 0x7e5   :  { %1810 = vst.msk [vmem:[%s3217_s10 + $0x18] sm:$0xff] %vm54_vm0, %v1802_v55 }
 0x7e6   :  { %1809 = vst.msk [vmem:[%s3217_s10 + $0x10] sm:$0xff] %vm54_vm0, %v1801_v57  ;;  %v2379_v44 = vpop.f32.mrb[44].mxu0 }
 0x7e7   :  { %v1804_v45 = vadd.f32 %v2379_v44, %v1962_v51  ;;  %v1773_v28 = vpop.f32.mrb[45].mxu0 }
 0x7e8   :  { %v1803_v30 = vadd.f32 %v1962_v51, %v1773_v28 }
 0x7e9   :  { %1812 = vst.msk [vmem:[%s3217_s10 + $0x28] sm:$0xff] %vm54_vm0, %v1804_v45 }
 0x7ea   :  { %1811 = vst.msk [vmem:[%s3217_s10 + $0x20] sm:$0xff] %vm54_vm0, %v1803_v30  ;;  %v2382_v46 = vpop.f32.mrb[46].mxu0 }
 0x7eb   :  { %v1806_v47 = vadd.f32 %v2382_v46, %v1962_v51  ;;  %v1783_v49 = vpop.f32.mrb[47].mxu0 }
 0x7ec   :  { %v1805_v33 = vadd.f32 %v1962_v51, %v1783_v49 }
 0x7ed   :  { %1814 = vst.msk [vmem:[%s3217_s10 + $0x38] sm:$0xff] %vm54_vm0, %v1806_v47 }
 0x7ee   :  { %1813 = vst.msk [vmem:[%s3217_s10 + $0x30] sm:$0xff] %vm54_vm0, %v1805_v33 }

</bundles_post_ra>
